<compile_context>
chip_gen: v7x
topology: tpu7x:2x2x1
jax: 0.10.0
libtpu: 0.0.40
codegen_flags: <defaults>
</compile_context>

<pallas_src>
import functools

import numpy as np
import jax
import jax.numpy as jnp
from jax import lax
from jax.experimental import pallas as pl
from jax.experimental.pallas import tpu as pltpu


def _round_up(x, m):
    return (x + m - 1) // m * m


# ---------------------------------------------------------------------------
# Kernel A: SimHash codes of the (padded) weight table, lane-dense [L, Cpad].
# ---------------------------------------------------------------------------
def _wcode_kernel(w_ref, b_ref, projT_ref, projb_ref, code_ref, *, K, L):
    # w_ref: [tc, Dpad], b_ref: [1, tc], projT_ref: [L*K, Dpad], projb_ref: [L*K, 1]
    proj = lax.dot_general(
        projT_ref[...], w_ref[...],
        dimension_numbers=(((1,), (1,)), ((), ())),
        preferred_element_type=jnp.float32)               # [L*K, tc]
    proj = proj + projb_ref[...] * b_ref[...]              # bias-column contribution
    bits = (proj > 0.0).astype(jnp.int32)                  # [L*K, tc]

    # Vectorized K-bit packing: weight each bit row by 2^k, then one sublane
    # segment-sum (XLU) per hash table instead of K slice-adds per table.
    k_of_row = lax.broadcasted_iota(jnp.int32, (L * K, 1), 0) % K
    pow2 = jnp.left_shift(1, k_of_row)                     # [L*K, 1]
    weighted = bits * pow2                                  # [L*K, tc]
    for l in range(L):
        code_ref[l:l + 1, :] = jnp.sum(
            weighted[l * K:(l + 1) * K, :], axis=0, keepdims=True)


def build_weight_codes(weight_pad, bias_row, projT, projb, *, K, L, tile_c):
    Cpad, Dpad = weight_pad.shape
    LK = L * K
    return pl.pallas_call(
        functools.partial(_wcode_kernel, K=K, L=L),
        out_shape=jax.ShapeDtypeStruct((L, Cpad), jnp.int32),
        grid=(Cpad // tile_c,),
        in_specs=[
            pl.BlockSpec((tile_c, Dpad), lambda i: (i, 0)),
            pl.BlockSpec((1, tile_c), lambda i: (0, i)),
            pl.BlockSpec((LK, Dpad), lambda i: (0, 0)),
            pl.BlockSpec((LK, 1), lambda i: (0, 0)),
        ],
        out_specs=pl.BlockSpec((L, tile_c), lambda i: (0, i)),
        compiler_params=pltpu.CompilerParams(
            dimension_semantics=("parallel",)),
    )(weight_pad, bias_row, projT, projb)


# ---------------------------------------------------------------------------
# Kernel B: bucket match.  For each query n, compare its [L, 1] code column
# against the whole [L, tile_c] code block, sublane max-reduce over L, OR
# across n.  Lane-dense [1, Cpad] int32 mask.
# ---------------------------------------------------------------------------
def _match_kernel(qcodeT_ref, wcode_ref, mask_ref, *, N):
    wc = wcode_ref[...]                                    # [L, tc] int32
    qc = qcodeT_ref[...]                                   # [L, N] int32
    hit = jnp.zeros(mask_ref.shape, jnp.int32)             # [1, tc]
    for n in range(N):
        eq = (wc == qc[:, n:n + 1]).astype(jnp.int32)      # lane-broadcast col
        hit = jnp.maximum(hit, jnp.max(eq, axis=0, keepdims=True))
    mask_ref[...] = hit


def bucket_match(qcodesT, wcodesT, *, tile_c):
    L, N = qcodesT.shape
    _, Cpad = wcodesT.shape
    return pl.pallas_call(
        functools.partial(_match_kernel, N=N),
        out_shape=jax.ShapeDtypeStruct((1, Cpad), jnp.int32),
        grid=(Cpad // tile_c,),
        in_specs=[
            pl.BlockSpec((L, N), lambda i: (0, 0)),
            pl.BlockSpec((L, tile_c), lambda i: (0, i)),
        ],
        out_specs=pl.BlockSpec((1, tile_c), lambda i: (0, i)),
        compiler_params=pltpu.CompilerParams(
            dimension_semantics=("parallel",)),
    )(qcodesT, wcodesT)


# ---------------------------------------------------------------------------
# Kernel C: fused candidate-weight gather + sampled logits matmul (+ bias).
# Double-buffered gather: rows for output tile i+1 are DMA'd from HBM into the
# other wbuf slot while the MXU consumes tile i.  One DMA semaphore per slot;
# one accumulated wait per slot whose byte count exactly matches the ts row
# copies that were started (same array / dtype on both sides).
# ---------------------------------------------------------------------------
def _sampled_logits_kernel(ids_ref, x_ref, b_ref, w_hbm_ref, o_ref,
                           wbuf_ref, sem_ref, *, ts):
    i = pl.program_id(0)
    nsteps = pl.num_programs(0)
    slot = lax.rem(i, 2)

    def start_tile(tile, to_slot):
        base = tile * ts

        @pl.loop(0, ts)
        def _(r):
            rid = ids_ref[base + r]
            pltpu.make_async_copy(
                w_hbm_ref.at[pl.ds(rid, 1)],
                wbuf_ref.at[to_slot, pl.ds(r, 1)],
                sem_ref.at[to_slot]).start()

    # Prime the pipeline: fetch tile 0 into slot 0 at the first step.
    @pl.when(i == 0)
    def _():
        start_tile(0, 0)

    # Accumulated wait: ts row copies of (1, Dpad) each signalled sem[slot];
    # this full-slot descriptor is exactly ts * Dpad * itemsize bytes of the
    # same dtype, so the semaphore byte accounting matches.
    pltpu.make_async_copy(w_hbm_ref.at[pl.ds(0, ts)],
                          wbuf_ref.at[slot],
                          sem_ref.at[slot]).wait()

    # Prefetch the next tile's rows into the other slot; these DMAs overlap
    # with the dot below.
    # TODO(synk): coalesce runs of consecutive candidate ids (they arrive
    # sorted from jnp.nonzero) into multi-row DMAs to cut descriptor count.
    @pl.when(i + 1 < nsteps)
    def _():
        start_tile(i + 1, 1 - slot)

    # bf16 MXU path: x arrives in the compute dtype; cast the gathered f32
    # rows to match (no-op for the f32 path).  Accumulation stays f32.
    w_tile = wbuf_ref[slot].astype(x_ref.dtype)            # [ts, Dpad]
    logits = lax.dot_general(
        x_ref[...], w_tile,
        dimension_numbers=(((1,), (1,)), ((), ())),        # contract on D, no .T
        preferred_element_type=jnp.float32)                # [Npad, ts] f32
    o_ref[...] = logits + b_ref[...]


def sampled_logits(ids_padded, x_pad, bias_g, weight_pad, *, ts):
    Npad, Dpad = x_pad.shape
    S_pad = ids_padded.shape[0]

    # Rough VMEM budget (v7x has 64 MiB physical / 32 MiB default scoped);
    # only set an explicit limit when the default would be tight.
    est = (2 * Npad * Dpad * x_pad.dtype.itemsize          # x (double buffered)
           + 2 * ts * 4                                    # bias tiles
           + 2 * Npad * ts * 4                             # output tiles
           + 2 * ts * Dpad * weight_pad.dtype.itemsize)    # wbuf slots
    vmem_limit = None
    if est > (12 << 20):
        vmem_limit = int(min(est + (8 << 20), 48 << 20))

    return pl.pallas_call(
        functools.partial(_sampled_logits_kernel, ts=ts),
        out_shape=jax.ShapeDtypeStruct((Npad, S_pad), jnp.float32),
        grid_spec=pltpu.PrefetchScalarGridSpec(
            num_scalar_prefetch=1,
            grid=(S_pad // ts,),
            in_specs=[
                pl.BlockSpec((Npad, Dpad), lambda i, ids: (0, 0)),
                pl.BlockSpec((1, ts), lambda i, ids: (0, i)),
                pl.BlockSpec(memory_space=pl.ANY),          # weights stay in HBM
            ],
            out_specs=pl.BlockSpec((Npad, ts), lambda i, ids: (0, i)),
            scratch_shapes=[
                pltpu.VMEM((2, ts, Dpad), jnp.float32),     # double-buffered gather
                pltpu.SemaphoreType.DMA((2,)),              # one sem per slot
            ],
        ),
        # "arbitrary": the gather prefetch is carried across grid steps.
        compiler_params=pltpu.CompilerParams(
            dimension_semantics=("arbitrary",),
            vmem_limit_bytes=vmem_limit),
    )(ids_padded, x_pad, bias_g, weight_pad)


# ---------------------------------------------------------------------------
# LSHSampledLayer (forward-pass equivalent of the PyTorch module)
# ---------------------------------------------------------------------------
class LSHSampledLayerPallas:

    def __init__(self, key, layer_size, K, L, num_class, tile_c=None, tile_s=256):
        self.D = layer_size
        self.K = K
        self.L = L
        self.num_class = num_class
        # Class-dim tile for the hashing/matching kernels: big (up to 2048) so
        # those kernels are not per-grid-step-overhead bound.
        self.tile_c = tile_c if tile_c is not None else min(2048, _round_up(num_class, 128))
        self.tile_s = tile_s            # v6e/v7x: 256 (default); v5e: 128
        self.Dpad = _round_up(layer_size, 128)
        self.Cpad = _round_up(num_class, self.tile_c)

        k_w, k_h = jax.random.split(key)
        initrange = 0.05
        # params.weight ~ U(-0.05, 0.05); params.bias = zeros([num_class, 1])
        self.weight = jax.random.uniform(
            k_w, (num_class, layer_size), jnp.float32, -initrange, initrange)
        self.bias = jnp.zeros((num_class, 1), jnp.float32)
        self.bias_flat = jnp.squeeze(self.bias, axis=1)

        # Padded copies used by the kernels (zero padding is inert).  Kept f32
        # so the per-row gather DMAs have exact byte accounting.
        self.weight_pad = jnp.zeros((self.Cpad, self.Dpad), jnp.float32)
        self.weight_pad = self.weight_pad.at[:num_class, :layer_size].set(self.weight)
        bias_row = jnp.zeros((1, self.Cpad), jnp.float32)
        bias_row = bias_row.at[0, :num_class].set(self.bias_flat)

        # SimHash projection over D+1 features, transposed & split (no concat).
        hp = jax.random.normal(k_h, (L * K, layer_size + 1), jnp.float32)
        self.projT = jnp.zeros((L * K, self.Dpad), jnp.float32)
        self.projT = self.projT.at[:, :layer_size].set(hp[:, :layer_size])
        self.projb = hp[:, layer_size:layer_size + 1]          # [L*K, 1]

        # lsh.insert_multi: hash every class row once, lane-dense codes [L, Cpad].
        self.wcodesT = build_weight_codes(
            self.weight_pad, bias_row, self.projT, self.projb,
            K=K, L=L, tile_c=self.tile_c)
        self.last_removed = None

    def _query_codes(self, x):
        """SimHash codes of [x | 1]; the ones column is folded into projb."""
        q = x @ self.projT[:, :self.D].T + self.projb[:, 0][None, :]   # [N, L*K]
        bits = (q > 0.0).astype(jnp.int32)
        weights = 2 ** jnp.arange(self.K, dtype=jnp.int32)
        return (bits.reshape(x.shape[0], self.L, self.K)
                * weights[None, None, :]).sum(-1)                      # [N, L]

    def forward(self, x, compute_dtype=jnp.bfloat16):
        N, D = x.shape

        # 1) query hash codes (tiny [N, L]) -> [L, N] for the matcher
        qcodes = self._query_codes(x)
        qcodesT = qcodes.T.astype(jnp.int32)

        # 2) bucket match over the class table (lane-dense [1, Cpad] mask)
        mask = bucket_match(qcodesT, self.wcodesT, tile_c=self.tile_c)
        mask_flat = mask[0, :self.num_class]

        # 3) candidate compaction.  One scalar D2H sync (count) is the minimum
        #    required by the dynamic-shape return contract of the module.
        count = int(jnp.sum(mask_flat))
        if count == 0:
            # Dense fallback: stream W at full HBM bandwidth instead of
            # routing every class row through the per-row gather kernel.
            sample_ids = jnp.arange(self.num_class, dtype=jnp.int32)
            logits = x @ self.weight.T + self.bias_flat[None, :]
            self.last_removed = sample_ids
            return logits, sample_ids

        ids_full = jnp.nonzero(mask_flat, size=self.num_class,
                               fill_value=0)[0].astype(jnp.int32)
        sample_ids = ids_full[:count]

        # 4) fused gather + sampled logits.  S_pad is bucketed (powers of two,
        #    >= ts, capped at round_up(num_class, ts)) so kernel C's grid and
        #    out_shape come from a small fixed set -> no per-forward recompile.
        ts = self.tile_s
        S_pad = min(max(ts, pl.next_power_of_2(count)),
                    _round_up(self.num_class, ts))
        # Padded candidate ids are 0 -> class-0 rows are gathered for padding
        # columns; they are sliced off below and never feed a reduction.
        ids_padded = jnp.zeros((S_pad,), jnp.int32).at[:count].set(sample_ids)
        bias_g = jnp.zeros((1, S_pad), jnp.float32).at[0, :count].set(
            self.bias_flat[sample_ids])

        Npad = _round_up(max(N, 16), 16)
        x_pad = jnp.zeros((Npad, self.Dpad), compute_dtype)
        x_pad = x_pad.at[:N, :D].set(x.astype(compute_dtype))

        logits_pad = sampled_logits(ids_padded, x_pad, bias_g, self.weight_pad,
                                    ts=ts)                              # [Npad, S_pad]
        logits = logits_pad[:N, :count]

        # TODO(synk): lsh.query_remove / insert_removed / rehash mutate a
        # host-side hash-table structure only; they do not affect forward outputs.
        self.last_removed = sample_ids
        return logits, sample_ids


# ---------------------------------------------------------------------------
# demo + self-check
# ---------------------------------------------------------------------------
if __name__ == "__main__":
    key = jax.random.PRNGKey(0)
    k_layer, k_x = jax.random.split(key)

    layer_size = 128     # D
    num_class = 512      # C
    K, L = 4, 3
    N = 8                # batch

    # tile_s=128 at demo scale keeps >= 2 grid steps so the double-buffered
    # gather / prefetch path is actually exercised (default 256 targets v6e/v7x).
    layer = LSHSampledLayerPallas(k_layer, layer_size, K, L, num_class, tile_s=128)
    x = jax.random.normal(k_x, (N, layer_size), jnp.float32)

    # bf16 MXU path (v6e/v7x recommendation) and f32 path (exactness check).
    logits_bf16, sample_ids = layer.forward(x, compute_dtype=jnp.bfloat16)
    jax.block_until_ready(logits_bf16)
    jax.block_until_ready(sample_ids)
    logits_f32, sample_ids_f32 = layer.forward(x, compute_dtype=jnp.float32)
    jax.block_until_ready(logits_f32)

    # --- reference checks (plain numpy / JAX) ---
    W = np.asarray(layer.weight)
    b_flat = np.asarray(layer.bias_flat)
    ids_np = np.asarray(sample_ids)
    assert np.array_equal(ids_np, np.asarray(sample_ids_f32)), "id mismatch across dtypes"

    # sampled logits against a dense gather + matmul reference
    ref_logits = np.asarray(x) @ W[ids_np].T + b_flat[ids_np][None, :]
    np.testing.assert_allclose(np.asarray(logits_f32), ref_logits,
                               rtol=1e-4, atol=1e-4)
    np.testing.assert_allclose(np.asarray(logits_bf16), ref_logits,
                               rtol=3e-2, atol=3e-2)

    # weight-table hash bits (skip sign-ambiguous near-zero projections)
    projT = np.asarray(layer.projT[:, :layer_size])        # [L*K, D]
    projb = np.asarray(layer.projb[:, 0])                  # [L*K]
    proj_ref = W @ projT.T + b_flat[:, None] * projb[None, :]
    bits_ref = proj_ref > 0.0
    wc = np.asarray(layer.wcodesT)[:, :num_class].T        # [C, L]
    bits_pal = np.stack([(wc[:, l] >> k) & 1
                         for l in range(L) for k in range(K)],
                        axis=1).astype(bool)
    safe = np.abs(proj_ref) > 1e-3
    assert np.array_equal(bits_pal[safe], bits_ref[safe]), "hash-code mismatch"

    # candidate set from the pallas codes + the same query codes
    qc = np.asarray(layer._query_codes(x))                 # [N, L]
    match_ref = np.zeros(num_class, dtype=bool)
    for n in range(N):
        for l in range(L):
            match_ref |= (wc[:, l] == qc[n, l])
    ids_ref = np.nonzero(match_ref)[0]
    if ids_ref.size == 0:
        ids_ref = np.arange(num_class)
    assert np.array_equal(np.sort(ids_np), ids_ref), "candidate-set mismatch"

    print("KERNEL_OK")
</pallas_src>

<mosaic_0001>
module attributes {stable_mosaic.version = 11 : i64} {
  func.func @_wcode_kernel(%arg0: i32, %arg1: memref<512x128xf32, #tpu.memory_space<vmem>>, %arg2: memref<1x512xf32, #tpu.memory_space<vmem>>, %arg3: memref<12x128xf32, #tpu.memory_space<vmem>>, %arg4: memref<12x1xf32, #tpu.memory_space<vmem>>, %arg5: memref<3x512xi32, #tpu.memory_space<vmem>>) attributes {dimension_semantics = [#tpu.dimension_semantics<parallel>], iteration_bounds = array<i64: 1>, scalar_prefetch = 0 : i64, scratch_operands = 0 : i64, tpu.core_type = #tpu.core_type<tc>, window_params = [{transform_indices = @transform_0, window_bounds = array<i64: 512, 128>}, {transform_indices = @transform_1, window_bounds = array<i64: 1, 512>}, {pipeline_mode = #tpu.pipeline_mode<synchronous>, transform_indices = @transform_2, window_bounds = array<i64: 12, 128>}, {pipeline_mode = #tpu.pipeline_mode<synchronous>, transform_indices = @transform_3, window_bounds = array<i64: 12, 1>}, {transform_indices = @transform_4, window_bounds = array<i64: 3, 512>}]} {
    %c0 = arith.constant 0 : index
    %c0_0 = arith.constant 0 : index
    %0 = vector.load %arg3[%c0, %c0_0] : memref<12x128xf32, #tpu.memory_space<vmem>>, vector<12x128xf32>
    %c0_1 = arith.constant 0 : index
    %c0_2 = arith.constant 0 : index
    %1 = vector.load %arg1[%c0_1, %c0_2] : memref<512x128xf32, #tpu.memory_space<vmem>>, vector<512x128xf32>
    %cst = arith.constant dense<0.000000e+00> : vector<12x512xf32>
    %2 = tpu.matmul %0, %1, %cst {dimension_numbers = #tpu.dot_dimension_numbers<[1], [1], [0], [0], [0, 0, 1, 0], [], []>} : vector<12x128xf32>, vector<512x128xf32>, vector<12x512xf32> -> vector<12x512xf32>
    %c0_3 = arith.constant 0 : index
    %c0_4 = arith.constant 0 : index
    %3 = vector.load %arg4[%c0_3, %c0_4] : memref<12x1xf32, #tpu.memory_space<vmem>>, vector<12x1xf32>
    %c0_5 = arith.constant 0 : index
    %c0_6 = arith.constant 0 : index
    %4 = vector.load %arg2[%c0_5, %c0_6] : memref<1x512xf32, #tpu.memory_space<vmem>>, vector<1x512xf32>
    %5 = vector.broadcast %3 : vector<12x1xf32> to vector<12x512xf32>
    %6 = vector.broadcast %4 : vector<1x512xf32> to vector<12x512xf32>
    %7 = arith.mulf %5, %6 : vector<12x512xf32>
    %8 = arith.addf %2, %7 : vector<12x512xf32>
    %cst_7 = arith.constant 0.000000e+00 : f32
    %9 = vector.broadcast %cst_7 : f32 to vector<12x512xf32>
    %10 = arith.cmpf ogt, %8, %9 : vector<12x512xf32>
    %11 = arith.extui %10 : vector<12x512xi1> to vector<12x512xi32>
    %12 = tpu.iota {dimensions = array<i32: 0>} : vector<12x1xi32>
    %c4_i32 = arith.constant 4 : i32
    %c0_i32 = arith.constant 0 : i32
    %13 = arith.cmpi eq, %c4_i32, %c0_i32 : i32
    %c1_i32 = arith.constant 1 : i32
    %14 = arith.select %13, %c1_i32, %c4_i32 : i32
    %15 = vector.broadcast %14 : i32 to vector<12x1xi32>
    %16 = arith.remsi %12, %15 : vector<12x1xi32>
    %c0_i32_8 = arith.constant 0 : i32
    %17 = vector.broadcast %c0_i32_8 : i32 to vector<12x1xi32>
    %18 = arith.cmpi ne, %16, %17 : vector<12x1xi32>
    %c0_i32_9 = arith.constant 0 : i32
    %19 = vector.broadcast %c0_i32_9 : i32 to vector<12x1xi32>
    %20 = arith.cmpi slt, %16, %19 : vector<12x1xi32>
    %c0_i32_10 = arith.constant 0 : i32
    %21 = arith.cmpi slt, %14, %c0_i32_10 : i32
    %22 = vector.broadcast %21 : i1 to vector<12x1xi1>
    %23 = vector.broadcast %22 : vector<12x1xi1> to vector<12x1xi1>
    %24 = arith.xori %20, %23 : vector<12x1xi1>
    %25 = arith.andi %24, %18 : vector<12x1xi1>
    %26 = vector.broadcast %14 : i32 to vector<12x1xi32>
    %27 = arith.addi %16, %26 : vector<12x1xi32>
    %28 = arith.select %25, %27, %16 : vector<12x1xi1>, vector<12x1xi32>
    %c1_i32_11 = arith.constant 1 : i32
    %29 = vector.broadcast %c1_i32_11 : i32 to vector<12x1xi32>
    %30 = arith.shli %29, %28 : vector<12x1xi32>
    %31 = vector.broadcast %30 : vector<12x1xi32> to vector<12x512xi32>
    %32 = arith.muli %11, %31 : vector<12x512xi32>
    %33 = vector.extract_strided_slice %32 {offsets = [0, 0], sizes = [4, 512], strides = [1, 1]} : vector<12x512xi32> to vector<4x512xi32>
    %cst_12 = arith.constant dense<0> : vector<512xi32>
    %34 = vector.multi_reduction <add>, %33, %cst_12 [0] : vector<4x512xi32> to vector<512xi32>
    %35 = vector.shape_cast %34 : vector<512xi32> to vector<1x512xi32>
    %c0_13 = arith.constant 0 : index
    %c0_14 = arith.constant 0 : index
    %36 = vector.load %arg5[%c0_13, %c0_14] : memref<3x512xi32, #tpu.memory_space<vmem>>, vector<1x512xi32>
    tpu.vector_store %arg5[%c0_13, %c0_14], %35 {strides = array<i32>} : memref<3x512xi32, #tpu.memory_space<vmem>>, vector<1x512xi32>,
    %37 = vector.extract_strided_slice %32 {offsets = [4, 0], sizes = [4, 512], strides = [1, 1]} : vector<12x512xi32> to vector<4x512xi32>
    %cst_15 = arith.constant dense<0> : vector<512xi32>
    %38 = vector.multi_reduction <add>, %37, %cst_15 [0] : vector<4x512xi32> to vector<512xi32>
    %39 = vector.shape_cast %38 : vector<512xi32> to vector<1x512xi32>
    %c1 = arith.constant 1 : index
    %c0_16 = arith.constant 0 : index
    %40 = vector.load %arg5[%c1, %c0_16] : memref<3x512xi32, #tpu.memory_space<vmem>>, vector<1x512xi32>
    tpu.vector_store %arg5[%c1, %c0_16], %39 {strides = array<i32>} : memref<3x512xi32, #tpu.memory_space<vmem>>, vector<1x512xi32>,
    %41 = vector.extract_strided_slice %32 {offsets = [8, 0], sizes = [4, 512], strides = [1, 1]} : vector<12x512xi32> to vector<4x512xi32>
    %cst_17 = arith.constant dense<0> : vector<512xi32>
    %42 = vector.multi_reduction <add>, %41, %cst_17 [0] : vector<4x512xi32> to vector<512xi32>
    %43 = vector.shape_cast %42 : vector<512xi32> to vector<1x512xi32>
    %c2 = arith.constant 2 : index
    %c0_18 = arith.constant 0 : index
    %44 = vector.load %arg5[%c2, %c0_18] : memref<3x512xi32, #tpu.memory_space<vmem>>, vector<1x512xi32>
    tpu.vector_store %arg5[%c2, %c0_18], %43 {strides = array<i32>} : memref<3x512xi32, #tpu.memory_space<vmem>>, vector<1x512xi32>,
    return
  }
  func.func @transform_0(%arg0: i32) -> (i32, i32) {
    %c0_i32 = arith.constant 0 : i32
    %c0_i32_0 = arith.constant 0 : i32
    return %arg0, %c0_i32 : i32, i32
  }
  func.func @transform_1(%arg0: i32) -> (i32, i32) {
    %c0_i32 = arith.constant 0 : i32
    %c0_i32_0 = arith.constant 0 : i32
    return %c0_i32, %arg0 : i32, i32
  }
  func.func @transform_2(%arg0: i32) -> (i32, i32) {
    %c0_i32 = arith.constant 0 : i32
    %c0_i32_0 = arith.constant 0 : i32
    %c0_i32_1 = arith.constant 0 : i32
    return %c0_i32, %c0_i32_0 : i32, i32
  }
  func.func @transform_3(%arg0: i32) -> (i32, i32) {
    %c0_i32 = arith.constant 0 : i32
    %c0_i32_0 = arith.constant 0 : i32
    %c0_i32_1 = arith.constant 0 : i32
    return %c0_i32, %c0_i32_0 : i32, i32
  }
  func.func @transform_4(%arg0: i32) -> (i32, i32) {
    %c0_i32 = arith.constant 0 : i32
    %c0_i32_0 = arith.constant 0 : i32
    return %c0_i32, %arg0 : i32, i32
  }
}

</mosaic_0001>

<bundles_post_ra>
// kernel: tpu_custom_call.1
= control target key start
LH: loop header
LB: loop body
LE: loop exit
PB: predicated region body
PF: predicated region fallthrough
CT: control target
= control target key end

     0   :  { %9 = vsyncpa [#allocation3], 0  ;;  %s860_s0 = inlined_call_operand.hbm [shape: f32[512,128], index: 0, kind: input, shape index: {}]   ;;  %s861_s1 = inlined_call_operand.vmem [shape: f32[1,512], index: 1, kind: input, shape index: {}]   ;;  %s862_s2 = inlined_call_operand.vmem [shape: f32[12,128], index: 2, kind: input, shape index: {}]   ;;  %s863_s3 = inlined_call_operand.vmem [shape: f32[12,1], index: 3, kind: input, shape index: {}]   ;;  %s864_s4 = inlined_call_operand.hbm [shape: s32[3,512], index: 4, kind: output, shape index: {}]  }
   0x1   :  { %10 = vsyncpa [#allocation4], 0  ;;  %s721_s15 = smov [#allocation2]   ;;  %s673_s19 = scalar_lea.hbm %s860_s0, 8192 }
   0x2   :  { %s16_s16 = sshll.u32 %s721_s15, 4  ;;  %p674_p0 = scmp.ne.s32.totalorder %s860_s0, %s673_s19  ;;  %s17_s16 = int_to_ptr.vmem [resolvable:$true] %s16_s16 }
   0x3   :  { %p677_p1 = scmp.lt.u32.totalorder %s673_s19, %s860_s0 }
   0x5   :  { %p679_p2 = pnand %p677_p1, %p674_p0 }
   0x7   :  { %682 = shalt.err (!%p679_p2)
}
   0x8   :  { %s683_s24 = scalar_lea.vmem %s17_s16, 8192  ;;  %p688_p4 = scmp.lt.s32.totalorder %s17_s16, %s17_s16 }
   0x9   :  { %p684_p3 = scmp.ne.s32.totalorder %s17_s16, %s683_s24  ;;  %p689_p5 = scmp.lt.s32.totalorder %s683_s24, %s683_s24 }
   0xb   :  { %p690_p6 = por %p689_p5, %p688_p4 }
   0xd   :  { %p691_p7 = pnand %p690_p6, %p684_p3 }
   0xf   :  { %694 = shalt.err (!%p691_p7)
}
  0x10   :  { %s722_s25 = smov 128   ;;  %s723_s26 = smov 8  }
  0x11   :  { %22 = dma.hbm_to_vmem [thread:$0]  %s860_s0, 8192, %s17_s16, [#allocation3], %s722_s25, %s722_s25, %s723_s26  }
  0x12   :  { %717 = dma.done.wait [#allocation3], 8192  }
  0x13   :  { %718 = vsyncadd [#allocation3], 4294959104  ;;  %v724_v0 = vmov 0   ;;  %v50_v1 = vld [vmem:[#allocation2 + $0x80] sm:$0xff]  ;;  %v51_v2 = vld [vmem:[#allocation2 + $0x88] sm:$0xff]  ;;  %vm347_vm0 = vcmask 1043456  }
  0x14   :  { %672 = vset.pattern.permute.xlu0 %v724_v0  ;;  %v82_v3 = vld [vmem:[#allocation2 + $0x180] sm:$0xff]  ;;  %v601_v4 = vpack.c.bf16 %v51_v2, %v50_v1  ;;  %v83_v5 = vld [vmem:[#allocation2 + $0x188] sm:$0xff]  ;;  %v52_v12 = vld [vmem:[#allocation2 + $0x90] sm:$0xff]  ;;  %vm405_vm1 = vcmask 1047556  }
  0x15   :  { %v34_v6 = vld [vmem:[#allocation2] sm:$0xff]  ;;  %v35_v7 = vld [vmem:[#allocation2 + $0x8] sm:$0xff]  ;;  %v633_v8 = vpack.c.bf16 %v83_v5, %v82_v3  ;;  %v53_v14 = vld [vmem:[#allocation2 + $0x98] sm:$0xff] }
  0x16   :  { %v603_v9 = vpack.c.bf16 %v35_v7, %v34_v6  ;;  %v66_v10 = vld [vmem:[#allocation2 + $0x100] sm:$0xff]  ;;  %v67_v11 = vld [vmem:[#allocation2 + $0x108] sm:$0xff]  ;;  %602 = vmatprep.subr.bf16.mxu0 %v601_v4  ;;  %v84_v15 = vld [vmem:[#allocation2 + $0x190] sm:$0xff]  ;;  %v605_v17 = vpack.c.bf16 %v53_v14, %v52_v12 }
  0x17   :  { %v635_v13 = vpack.c.bf16 %v67_v11, %v66_v10  ;;  %v85_v16 = vld [vmem:[#allocation2 + $0x198] sm:$0xff]  ;;  %634 = vmatprep.subr.bf16.mxu1 %v633_v8  ;;  %v36_v19 = vld [vmem:[#allocation2 + $0x10] sm:$0xff]  ;;  %v54_v23 = vld [vmem:[#allocation2 + $0xa0] sm:$0xff] }
  0x18   :  { %604 = vmatpush3.bf16.xpose.msra.mxu0 %v603_v9  ;;  %v637_v18 = vpack.c.bf16 %v85_v16, %v84_v15  ;;  %v37_v20 = vld [vmem:[#allocation2 + $0x18] sm:$0xff]  ;;  %v68_v21 = vld [vmem:[#allocation2 + $0x110] sm:$0xff]  ;;  %v55_v24 = vld [vmem:[#allocation2 + $0xa8] sm:$0xff] }
  0x19   :  { %636 = vmatpush3.bf16.xpose.msra.mxu1 %v635_v13  ;;  %606 = vmatprep.subr.bf16.mxu0 %v605_v17  ;;  %v69_v22 = vld [vmem:[#allocation2 + $0x118] sm:$0xff]  ;;  %v86_v25 = vld [vmem:[#allocation2 + $0x1a0] sm:$0xff]  ;;  %v87_v26 = vld [vmem:[#allocation2 + $0x1a8] sm:$0xff]  ;;  %v607_v27 = vpack.c.bf16 %v37_v20, %v36_v19  ;;  %v609_v29 = vpack.c.bf16 %v55_v24, %v54_v23 }
  0x1a   :  { %638 = vmatprep.subr.bf16.mxu1 %v637_v18  ;;  %v639_v28 = vpack.c.bf16 %v69_v22, %v68_v21  ;;  %v641_v30 = vpack.c.bf16 %v87_v26, %v86_v25  ;;  %v38_v31 = vld [vmem:[#allocation2 + $0x20] sm:$0xff]  ;;  %v39_v32 = vld [vmem:[#allocation2 + $0x28] sm:$0xff]  ;;  %v56_v35 = vld [vmem:[#allocation2 + $0xb0] sm:$0xff] }
  0x1b   :  { %v70_v33 = vld [vmem:[#allocation2 + $0x120] sm:$0xff]  ;;  %v71_v34 = vld [vmem:[#allocation2 + $0x128] sm:$0xff]  ;;  %v57_v36 = vld [vmem:[#allocation2 + $0xb8] sm:$0xff]  ;;  %v611_v39 = vpack.c.bf16 %v39_v32, %v38_v31 }
  0x1c   :  { %v88_v37 = vld [vmem:[#allocation2 + $0x1b0] sm:$0xff]  ;;  %v89_v38 = vld [vmem:[#allocation2 + $0x1b8] sm:$0xff]  ;;  %v643_v40 = vpack.c.bf16 %v71_v34, %v70_v33  ;;  %v613_v41 = vpack.c.bf16 %v57_v36, %v56_v35  ;;  %v769_v47 = vld [vmem:[%s862_s2] sm:$0xff] }
  0x1d   :  { %v645_v42 = vpack.c.bf16 %v89_v38, %v88_v37  ;;  %v40_v43 = vld [vmem:[#allocation2 + $0x30] sm:$0xff]  ;;  %v41_v44 = vld [vmem:[#allocation2 + $0x38] sm:$0xff]  ;;  %v58_v48 = vld [vmem:[#allocation2 + $0xc0] sm:$0xff]  ;;  %561 = vmatprep.mubr.f32.mxu0 %v769_v47  ;;  %597 = vmatprep.mubr.f32.mxu1 %v769_v47  ;;  %v112_v38 = vlaneseq }
  0x1e   :  { %v72_v45 = vld [vmem:[#allocation2 + $0x130] sm:$0xff]  ;;  %v73_v46 = vld [vmem:[#allocation2 + $0x138] sm:$0xff]  ;;  %v59_v49 = vld [vmem:[#allocation2 + $0xc8] sm:$0xff]  ;;  %v615_v53 = vpack.c.bf16 %v41_v44, %v40_v43 }
  0x1f   :  { %v98_v50 = vld [vmem:[%s863_s3] sm:$0xff]  ;;  %v91_v52 = vld [vmem:[#allocation2 + $0x1c8] sm:$0xff]  ;;  %v647_v55 = vpack.c.bf16 %v73_v46, %v72_v45  ;;  %v617_v56 = vpack.c.bf16 %v59_v49, %v58_v48  ;;  %v60_v62 = vld [vmem:[#allocation2 + $0xd0] sm:$0xff]  ;;  %vm831_vm10 = vcmp.lt.s32.totalorder %v112_v38, 512 }
  0x20   :  { %608 = vmatpush3.bf16.xpose.msra.mxu0 %v607_v27  ;;  %v90_v51 = vld [vmem:[#allocation2 + $0x1c0] sm:$0xff]  ;;  %103 = vperm.xlu0 %672, %v98_v50   ;;  %v99_v54 = vld [vmem:[%s863_s3 + $0x8] sm:$0xf]  ;;  %v61_v63 = vld [vmem:[#allocation2 + $0xd8] sm:$0xff] }
  0x21   :  { %640 = vmatpush3.bf16.xpose.msra.mxu1 %v639_v28  ;;  %610 = vmatprep.subr.bf16.mxu0 %v609_v29  ;;  %v649_v57 = vpack.c.bf16 %v91_v52, %v90_v51  ;;  %v42_v58 = vld [vmem:[#allocation2 + $0x40] sm:$0xff]  ;;  %v43_v59 = vld [vmem:[#allocation2 + $0x48] sm:$0xff]  ;;  %v92_v1 = vld [vmem:[#allocation2 + $0x1d0] sm:$0xff]  ;;  %v621_v5 = vpack.c.bf16 %v61_v63, %v60_v62  ;;  %v725_v52 = vmov 1966171168  }
  0x22   :  { %642 = vmatprep.subr.bf16.mxu1 %v641_v30  ;;  %v74_v60 = vld [vmem:[#allocation2 + $0x140] sm:$0xff]  ;;  %v75_v61 = vld [vmem:[#allocation2 + $0x148] sm:$0xff]  ;;  %v93_v2 = vld [vmem:[#allocation2 + $0x1d8] sm:$0xff]  ;;  %v619_v3 = vpack.c.bf16 %v43_v59, %v42_v58 }
  0x23   :  { %v651_v4 = vpack.c.bf16 %v75_v61, %v74_v60  ;;  %v653_v6 = vpack.c.bf16 %v93_v2, %v92_v1  ;;  %v44_v7 = vld [vmem:[#allocation2 + $0x50] sm:$0xff]  ;;  %v45_v8 = vld [vmem:[#allocation2 + $0x58] sm:$0xff]  ;;  %v62_v11 = vld [vmem:[#allocation2 + $0xe0] sm:$0xff]  ;;  %v726_v61 = vmov 1  }
  0x24   :  { %108 = vperm.xlu0 %672, %v99_v54   ;;  %v76_v9 = vld [vmem:[#allocation2 + $0x150] sm:$0xff]  ;;  %v77_v10 = vld [vmem:[#allocation2 + $0x158] sm:$0xff]  ;;  %v63_v12 = vld [vmem:[#allocation2 + $0xe8] sm:$0xff]  ;;  %v623_v15 = vpack.c.bf16 %v45_v8, %v44_v7 }
  0x25   :  { %v94_v13 = vld [vmem:[#allocation2 + $0x1e0] sm:$0xff]  ;;  %v95_v14 = vld [vmem:[#allocation2 + $0x1e8] sm:$0xff]  ;;  %v655_v16 = vpack.c.bf16 %v77_v10, %v76_v9  ;;  %v625_v17 = vpack.c.bf16 %v63_v12, %v62_v11  ;;  %v64_v23 = vld [vmem:[#allocation2 + $0xf0] sm:$0xff] }
  0x26   :  { %v657_v18 = vpack.c.bf16 %v95_v14, %v94_v13  ;;  %v46_v19 = vld [vmem:[#allocation2 + $0x60] sm:$0xff]  ;;  %v47_v20 = vld [vmem:[#allocation2 + $0x68] sm:$0xff]  ;;  %v65_v24 = vld [vmem:[#allocation2 + $0xf8] sm:$0xff] }
  0x27   :  { %v78_v21 = vld [vmem:[#allocation2 + $0x160] sm:$0xff]  ;;  %v79_v22 = vld [vmem:[#allocation2 + $0x168] sm:$0xff]  ;;  %v96_v25 = vld [vmem:[#allocation2 + $0x1f0] sm:$0xff]  ;;  %v627_v27 = vpack.c.bf16 %v47_v20, %v46_v19  ;;  %v629_v29 = vpack.c.bf16 %v65_v24, %v64_v23 }
  0x28   :  { %612 = vmatpush3.bf16.xpose.msra.mxu0 %v611_v39  ;;  %v97_v26 = vld [vmem:[#allocation2 + $0x1f8] sm:$0xff]  ;;  %v659_v28 = vpack.c.bf16 %v79_v22, %v78_v21  ;;  %v48_v31 = vld [vmem:[#allocation2 + $0x70] sm:$0xff]  ;;  %v33_v37 = vld [vmem:[%s862_s2 + $0x8] sm:$0xf]  ;;  %v113_v39 = vshrl.u32 %v112_v38, 7 }
  0x29   :  { %644 = vmatpush3.bf16.xpose.msra.mxu1 %v643_v40  ;;  %614 = vmatprep.subr.bf16.mxu0 %v613_v41  ;;  %v661_v30 = vpack.c.bf16 %v97_v26, %v96_v25  ;;  %v49_v32 = vld [vmem:[#allocation2 + $0x78] sm:$0xff]  ;;  %v80_v33 = vld [vmem:[#allocation2 + $0x170] sm:$0xff]  ;;  %v100_v41 = vld [vmem:[%s861_s1] sm:$0xf]  ;;  %s727_s1 = smov [#allocation5]  }
  0x2a   :  { %646 = vmatprep.subr.bf16.mxu1 %v645_v42  ;;  %v81_v34 = vld [vmem:[#allocation2 + $0x178] sm:$0xff]  ;;  %v631_v35 = vpack.c.bf16 %v49_v32, %v48_v31  ;;  %v114_v40 = vsub.s32 0, %v113_v39  ;;  %v122_v42 = vsub.s32 2, %v113_v39  ;;  %v118_v43 = vsub.s32 1, %v113_v39  ;;  %s520_s2 = sshll.u32 %s727_s1, 4  ;;  %s521_s2 = int_to_ptr.vmem [resolvable:$true] %s520_s2 }
  0x2b   :  { %v663_v36 = vpack.c.bf16 %v81_v34, %v80_v33  ;;  %v126_v44 = vsub.s32 3, %v113_v39  ;;  %v312_v50 = vadd.s32 8, %v113_v39  ;;  %v317_v51 = vand.u32 3, %v113_v39  ;;  %s695_s11 = scalar_lea.vmem %s521_s2, 256  ;;  %p700_p9 = scmp.lt.s32.totalorder %s521_s2, %s521_s2 }
  0x2c   :  { %v115_v46 = vrot.slane %v100_v41, %v114_v40  ;;  %v123_v48 = vrot.slane %v100_v41, %v122_v42  ;;  %v119_v49 = vrot.slane %v100_v41, %v118_v43  ;;  %p696_p8 = scmp.ne.s32.totalorder %s521_s2, %s695_s11  ;;  %p701_p10 = scmp.lt.s32.totalorder %s695_s11, %s695_s11 }
  0x2d   :  { %v324_v59 = vand.u32 3, %v312_v50  ;;  %v337_v62 = vshll.u32 %v726_v61, %v317_v51 }
  0x2e   :  { %p702_p11 = por %p701_p10, %p700_p9 }
  0x2f   :  { %v790_v11 = vshll.u32 %v726_v61, %v324_v59 }
  0x30   :  { %616 = vmatpush3.bf16.xpose.msra.mxu0 %v615_v53  ;;  %v379_v53 = vunpack.c.l.s4 %v725_v52  ;;  %p703_p12 = pnand %p702_p11, %p696_p8 }
  0x31   :  { %648 = vmatpush3.bf16.xpose.msra.mxu1 %v647_v55  ;;  %618 = vmatprep.subr.bf16.mxu0 %v617_v56 }
  0x32   :  { %650 = vmatprep.subr.bf16.mxu1 %v649_v57  ;;  %v380_v63 = vunpack.c.0.s8 %v379_v53 }
  0x34   :  { %v795_v14 = vsub.s32 %v380_v63, %v113_v39 }
  0x38   :  { %620 = vmatpush3.bf16.xpose.msra.mxu0 %v619_v3 }
  0x39   :  { %652 = vmatpush3.bf16.xpose.msra.mxu1 %v651_v4  ;;  %622 = vmatprep.subr.bf16.mxu0 %v621_v5 }
  0x3a   :  { %654 = vmatprep.subr.bf16.mxu1 %v653_v6 }
  0x40   :  { %624 = vmatpush3.bf16.xpose.msra.mxu0 %v623_v15 }
  0x41   :  { %656 = vmatpush3.bf16.xpose.msra.mxu1 %v655_v16  ;;  %626 = vmatprep.subr.bf16.mxu0 %v625_v17 }
  0x42   :  { %658 = vmatprep.subr.bf16.mxu1 %v657_v18 }
  0x48   :  { %628 = vmatpush3.bf16.xpose.msra.mxu0 %v627_v27 }
  0x49   :  { %660 = vmatpush3.bf16.xpose.msra.mxu1 %v659_v28  ;;  %630 = vmatprep.subr.bf16.mxu0 %v629_v29 }
  0x4a   :  { %662 = vmatprep.subr.bf16.mxu1 %v661_v30 }
  0x50   :  { %632 = vmatpush3.bf16.xpose.msra.mxu0 %v631_v35 }
  0x51   :  { %664 = vmatpush3.bf16.xpose.msra.mxu1 %v663_v36 }
  0x57   :  { %562 = vmatmul.mubr.f32.vlgmr.msra.gmra.mrb[0].mxu0 %v769_v47 }
  0x58   :  { %598 = vmatmul.mubr.f32.vlgmr.msra.gmra.mrb[0].mxu1 %v769_v47  ;;  %563 = vmatprep.mubr.f32.mxu0 %v33_v37  ;;  %v127_v47 = vrot.slane %v100_v41, %v126_v44 }
  0x59   :  { %599 = vmatprep.mubr.f32.mxu1 %v33_v37 }
  0x5b   :  { %564 = vmatmul.mubr.f32.gmra.mrb[2].mxu0 %v33_v37 }
  0x5c   :  { %600 = vmatmul.mubr.f32.gmra.mrb[2].mxu1 %v33_v37 }
  0x9f   :  { %v104_v45 = vpop.permute.xlu0 %103 }
  0xa0   :  { %v132_v54 = vmul.f32 %v115_v46, %v104_v45  ;;  %v134_v56 = vmul.f32 %v123_v48, %v104_v45  ;;  %v133_v57 = vmul.f32 %v119_v49, %v104_v45  ;;  %v135_v58 = vmul.f32 %v127_v47, %v104_v45 }
  0xa3   :  { %v109_v55 = vpop.permute.xlu0 %108 }
  0xa4   :  { %v136_v4 = vmul.f32 %v115_v46, %v109_v55  ;;  %v138_v8 = vmul.f32 %v123_v48, %v109_v55  ;;  %v788_v9 = vmul.f32 %v119_v49, %v109_v55  ;;  %v792_v12 = vmul.f32 %v127_v47, %v109_v55 }
 0x12a   :  { %v206_v60 = vpop.f32.mrb[0].mxu0 }
 0x12b   :  { %v207_v1 = vadd.f32 %v206_v60, %v132_v54  ;;  %v283_v2 = vpop.f32.mrb[0].mxu1  ;;  %v208_v3 = vpop.f32.mrb[1].mxu0 }
 0x12c   :  { %v284_v5 = vadd.f32 %v283_v2, %v134_v56  ;;  %v209_v6 = vadd.f32 %v208_v3, %v133_v57  ;;  %v285_v7 = vpop.f32.mrb[1].mxu1 }
 0x12d   :  { %vm294_vm2 = vcmp.gt.f32.partialorder %v207_v1, 0.0  ;;  %v286_v10 = vadd.f32 %v285_v7, %v135_v58 }
 0x12e   :  { %v302_v13 = vsel %vm294_vm2, 1, %v724_v0  ;;  %vm296_vm3 = vcmp.gt.f32.partialorder %v284_v5, 0.0  ;;  %vm295_vm4 = vcmp.gt.f32.partialorder %v209_v6, 0.0  ;;  %v212_v15 = vpop.f32.mrb[2].mxu0 }
 0x12f   :  { %v339_v16 = vmul.u32 %v337_v62, %v302_v13  ;;  %v304_v17 = vsel %vm296_vm3, 1, %v724_v0  ;;  %v303_v18 = vsel %vm295_vm4, 1, %v724_v0  ;;  %vm297_vm5 = vcmp.gt.f32.partialorder %v286_v10, 0.0  ;;  %v289_v19 = vpop.f32.mrb[2].mxu1  ;;  %v799_v20 = vpop.f32.mrb[3].mxu0 }
 0x130   :  { %v341_v21 = vmul.u32 %v337_v62, %v304_v17  ;;  %v340_v22 = vmul.u32 %v337_v62, %v303_v18  ;;  %v305_v23 = vsel %vm297_vm5, 1, %v724_v0  ;;  %v213_v24 = vadd.f32 %v212_v15, %v136_v4  ;;  %v802_v25 = vpop.f32.mrb[3].mxu1 }
 0x131   :  { %v348_v26 = vsel %vm347_vm0, %v339_v16, 0  ;;  %v406_v27 = vsel %vm405_vm1, %v339_v16, 0  ;;  %v342_v28 = vmul.u32 %v337_v62, %v305_v23  ;;  %v290_v29 = vadd.f32 %v289_v19, %v138_v8 }
 0x132   :  { %v349_v30 = vrot.slane %v348_v26, 4  ;;  %v407_v31 = vrot.slane %v406_v27, 4  ;;  %v362_v32 = vsel %vm347_vm0, %v341_v21, 0  ;;  %v420_v33 = vsel %vm405_vm1, %v341_v21, 0 }
 0x133   :  { %v363_v34 = vrot.slane %v362_v32, 4  ;;  %v421_v35 = vrot.slane %v420_v33, 4  ;;  %v355_v36 = vsel %vm347_vm0, %v340_v22, 0  ;;  %v413_v37 = vsel %vm405_vm1, %v340_v22, 0 }
 0x134   :  { %v350_v39 = vadd.s32 %v349_v30, %v348_v26  ;;  %v408_v40 = vadd.s32 %v407_v31, %v406_v27  ;;  %v356_v41 = vrot.slane %v355_v36, 4  ;;  %v414_v42 = vrot.slane %v413_v37, 4 }
 0x135   :  { %v364_v43 = vadd.s32 %v363_v34, %v362_v32  ;;  %v422_v44 = vadd.s32 %v421_v35, %v420_v33  ;;  %v369_v45 = vsel %vm347_vm0, %v342_v28, 0  ;;  %v427_v46 = vsel %vm405_vm1, %v342_v28, 0 }
 0x136   :  { %v351_v48 = vrot.slane %v350_v39, 2  ;;  %v409_v49 = vrot.slane %v408_v40, 2  ;;  %v357_v47 = vadd.s32 %v356_v41, %v355_v36  ;;  %v415_v50 = vadd.s32 %v414_v42, %v413_v37 }
 0x137   :  { %v365_v51 = vrot.slane %v364_v43, 2  ;;  %v423_v52 = vrot.slane %v422_v44, 2  ;;  %v370_v53 = vrot.slane %v369_v45, 4  ;;  %v428_v54 = vrot.slane %v427_v46, 4 }
 0x138   :  { %v352_v55 = vadd.s32 %v351_v48, %v350_v39  ;;  %v410_v56 = vadd.s32 %v409_v49, %v408_v40  ;;  %v358_v57 = vrot.slane %v357_v47, 2  ;;  %v416_v58 = vrot.slane %v415_v50, 2 }
 0x139   :  { %v366_v59 = vadd.s32 %v365_v51, %v364_v43  ;;  %v424_v60 = vadd.s32 %v423_v52, %v422_v44  ;;  %v371_v61 = vadd.s32 %v370_v53, %v369_v45  ;;  %v429_v62 = vadd.s32 %v428_v54, %v427_v46 }
 0x13a   :  { %v353_v63 = vrot.slane %v352_v55, 1  ;;  %v411_v1 = vrot.slane %v410_v56, 1  ;;  %v359_v2 = vadd.s32 %v358_v57, %v357_v47  ;;  %v417_v3 = vadd.s32 %v416_v58, %v415_v50 }
 0x13b   :  { %v367_v4 = vrot.slane %v366_v59, 1  ;;  %v425_v5 = vrot.slane %v424_v60, 1  ;;  %v372_v6 = vrot.slane %v371_v61, 2  ;;  %v430_v7 = vrot.slane %v429_v62, 2 }
 0x13c   :  { %v354_v8 = vadd.s32 %v353_v63, %v352_v55  ;;  %v412_v10 = vadd.s32 %v411_v1, %v410_v56  ;;  %v360_v13 = vrot.slane %v359_v2, 1  ;;  %v418_v15 = vrot.slane %v417_v3, 1 }
 0x13d   :  { %v368_v16 = vadd.s32 %v367_v4, %v366_v59  ;;  %v426_v17 = vadd.s32 %v425_v5, %v424_v60  ;;  %v373_v18 = vadd.s32 %v372_v6, %v371_v61  ;;  %v431_v19 = vadd.s32 %v430_v7, %v429_v62 }
 0x13e   :  { %v361_v21 = vadd.s32 %v360_v13, %v359_v2  ;;  %v419_v22 = vadd.s32 %v418_v15, %v417_v3  ;;  %vm298_vm6 = vcmp.gt.f32.partialorder %v213_v24, 0.0  ;;  %vm300_vm7 = vcmp.gt.f32.partialorder %v290_v29, 0.0 }
 0x13f   :  { %v374_v23 = vrot.slane %v373_v18, 1  ;;  %v432_v26 = vrot.slane %v431_v19, 1  ;;  %v306_v27 = vsel %vm298_vm6, 1, %v724_v0  ;;  %v308_v28 = vsel %vm300_vm7, 1, %v724_v0 }
 0x140   :  { %v376_v30 = vcombine.low %v354_v8, %v361_v21  ;;  %v434_v31 = vcombine.low %v412_v10, %v419_v22  ;;  %v343_v32 = vmul.u32 %v790_v11, %v306_v27  ;;  %v345_v33 = vmul.u32 %v790_v11, %v308_v28 }
 0x141   :  { %v375_v34 = vadd.s32 %v374_v23, %v373_v18  ;;  %v433_v35 = vadd.s32 %v432_v26, %v431_v19  ;;  %v215_v36 = vadd.f32 %v799_v20, %v788_v9  ;;  %v292_v24 = vadd.f32 %v802_v25, %v792_v12 }
 0x142   :  { %v460_v29 = vsel %vm347_vm0, %v343_v32, 0  ;;  %v474_v37 = vsel %vm347_vm0, %v345_v33, 0  ;;  %v384_v43 = vrot.slane %v376_v30, %v795_v14  ;;  %v442_v44 = vrot.slane %v434_v31, %v795_v14 }
 0x143   :  { %v377_v39 = vcombine.low %v368_v16, %v375_v34  ;;  %v435_v40 = vcombine.low %v426_v17, %v433_v35  ;;  %v461_v41 = vrot.slane %v460_v29, 4  ;;  %v475_v42 = vrot.slane %v474_v37, 4 }
 0x144   :  { %vm299_vm8 = vcmp.gt.f32.partialorder %v215_v36, 0.0  ;;  %vm301_vm9 = vcmp.gt.f32.partialorder %v292_v24, 0.0 }
 0x145   :  { %v391_v45 = vrot.slane %v377_v39, %v795_v14  ;;  %v449_v9 = vrot.slane %v435_v40, %v795_v14  ;;  %v462_v20 = vadd.s32 %v461_v41, %v460_v29  ;;  %v476_v12 = vadd.s32 %v475_v42, %v474_v37 }
 0x146   :  { %v307_v25 = vsel %vm299_vm8, 1, %v724_v0  ;;  %v309_v46 = vsel %vm301_vm9, 1, %v724_v0 }
 0x147   :  { %v463_v48 = vrot.slane %v462_v20, 2  ;;  %v477_v49 = vrot.slane %v476_v12, 2  ;;  %v344_v47 = vmul.u32 %v790_v11, %v307_v25  ;;  %v346_v50 = vmul.u32 %v790_v11, %v309_v46 }
 0x148   :  { %v392_v51 = vcombine.low %v384_v43, %v391_v45  ;;  %v450_v53 = vcombine.low %v442_v44, %v449_v9 }
 0x149   :  { %v464_v54 = vadd.s32 %v463_v48, %v462_v20  ;;  %v478_v55 = vadd.s32 %v477_v49, %v476_v12  ;;  %v467_v56 = vsel %vm347_vm0, %v344_v47, 0  ;;  %v481_v57 = vsel %vm347_vm0, %v346_v50, 0 }
 0x14a   :  { %v468_v0 = vrot.slane %v467_v56, 4  ;;  %v482_v58 = vrot.slane %v481_v57, 4  ;;  %v399_v59 = vrot.slane %v392_v51, %v795_v14  ;;  %v457_v60 = vrot.slane %v450_v53, %v795_v14 }
 0x14b   :  { %v465_v38 = vrot.slane %v464_v54, 1  ;;  %v479_v62 = vrot.slane %v478_v55, 1 }
 0x14c   :  { %v469_v11 = vadd.s32 %v468_v0, %v467_v56  ;;  %v483_v61 = vadd.s32 %v482_v58, %v481_v57  ;;  %404 = vst.msk [vmem:[#allocation5] ss:$4 sm:$0xf] %vm831_vm10, %v399_v59  ;;  %459 = vst.msk [vmem:[#allocation5 + $0x1] ss:$4 sm:$0xf] %vm831_vm10, %v457_v60 }
 0x14d   :  { %v466_v4 = vadd.s32 %v465_v38, %v464_v54  ;;  %v480_v5 = vadd.s32 %v479_v62, %v478_v55 }
 0x14e   :  { %v470_v63 = vrot.slane %v469_v11, 2  ;;  %v484_v1 = vrot.slane %v483_v61, 2 }
 0x150   :  { %v471_v2 = vadd.s32 %v470_v63, %v469_v11  ;;  %v485_v3 = vadd.s32 %v484_v1, %v483_v61 }
 0x152   :  { %v472_v6 = vrot.slane %v471_v2, 1  ;;  %v486_v7 = vrot.slane %v485_v3, 1 }
 0x154   :  { %v473_v8 = vadd.s32 %v472_v6, %v471_v2  ;;  %v487_v10 = vadd.s32 %v486_v7, %v485_v3 }
 0x156   :  { %v488_v13 = vcombine.low %v466_v4, %v473_v8  ;;  %v489_v15 = vcombine.low %v480_v5, %v487_v10 }
 0x158   :  { %v496_v16 = vrot.slane %v488_v13, %v795_v14  ;;  %v503_v17 = vrot.slane %v489_v15, %v795_v14 }
 0x15a   :  { %v504_v18 = vcombine.low %v496_v16, %v503_v17 }
 0x15c   :  { %v511_v19 = vrot.slane %v504_v18, %v795_v14 }
 0x15e   :  { %513 = vst.msk [vmem:[#allocation5 + $0x2] ss:$4 sm:$0xf] %vm831_vm10, %v511_v19 }
 0x15f   :  { %706 = shalt.err (!%p703_p12)
}
 0x160   :  { %s707_s14 = scalar_lea.hbm %s864_s4, 256 }
 0x161   :  { %p708_p13 = scmp.ne.s32.totalorder %s864_s4, %s707_s14  ;;  %p711_p0 = scmp.lt.u32.totalorder %s707_s14, %s864_s4 }
 0x163   :  { %p713_p1 = pnand %p711_p0, %p708_p13 }
 0x165   :  { %716 = shalt.err (!%p713_p1)
}
 0x166   :  { %523 = dma.vmem_to_hbm [thread:$0]  %s521_s2, 256, %s864_s4, [#allocation4]  }
 0x167   :  { %719 = dma.done.wait [#allocation4], 256  }
 0x168   :  { %720 = vsyncadd [#allocation4], 4294967040 }
 0x169   :  { %527 = vsyncpa [#allocation3], 1 }
 0x16a   :  { %528 = vsyncpa [#allocation4], 1 }

</bundles_post_ra>
